<compile_context>
chip_gen: v7x
topology: tpu7x:2x2x1
jax: 0.10.0
libtpu: 0.0.40
codegen_flags: <defaults>
</compile_context>

<pallas_src>
import functools

import jax
import jax.numpy as jnp
from jax.experimental import pallas as pl
from jax.experimental.pallas import tpu as pltpu


def _round_up(x, m):
    return (x + m - 1) // m * m


def _embedding_kernel(*refs, p, training, keep_threshold):
    # training: (idx_ref, table_ref, bits_ref, out_ref, acc_ref)
    # eval    : (idx_ref, table_ref,           out_ref, acc_ref)
    if training:
        idx_ref, table_ref, bits_ref, out_ref, acc_ref = refs
    else:
        idx_ref, table_ref, out_ref, acc_ref = refs
        bits_ref = None

    k = pl.program_id(1)                     # vocab-tile (reduction) index
    nk = pl.num_programs(1)
    T = idx_ref.shape[0]
    TV = table_ref.shape[0]

    @pl.when(k == 0)
    def _():
        acc_ref[...] = jnp.zeros_like(acc_ref)

    idx = idx_ref[...]                                            # (T, 1) int32
    lane = jax.lax.broadcasted_iota(jnp.int32, (T, TV), 1)        # (T, TV)
    # one-hot against this vocab tile only; cast is exact (values are 0/1)
    onehot = ((lane + k * TV) == idx).astype(table_ref.dtype)     # (T, TV)
    acc_ref[...] += jnp.dot(onehot, table_ref[...],
                            preferred_element_type=jnp.float32)   # (T, E)

    @pl.when(k == nk - 1)
    def _():
        emb = acc_ref[...]
        if training:
            # inverted dropout: keep with prob (1 - p), scale kept by 1/(1-p)
            keep = bits_ref[...] >= jnp.uint32(keep_threshold)
            emb = jnp.where(keep, emb * jnp.float32(1.0 / (1.0 - p)),
                            jnp.float32(0.0))
        out_ref[...] = emb.astype(out_ref.dtype)


def embedding_forward(input_seqs, table, *, p=0.5, training=False, rng=None,
                      token_tile=256, vocab_tile=2048):
    """input_seqs: (B, S) int ids; table: (V, E) -> (B, S, E) in table.dtype."""
    B, S = input_seqs.shape
    V, E = table.shape
    N = B * S

    # Token tile: multiple of 8, default 256; clamp so tiny inputs aren't over-padded.
    T = min(_round_up(token_tile, 8), _round_up(N, 8))
    # Vocab tile: multiple of 8, bounded so the table block stays small in VMEM.
    TV = min(_round_up(vocab_tile, 8), _round_up(V, 8))

    N_pad = _round_up(N, T)
    V_pad = _round_up(V, TV)

    idx_flat = input_seqs.reshape(N).astype(jnp.int32)
    if N_pad != N:
        idx_flat = jnp.pad(idx_flat, (0, N_pad - N))      # pads with id 0 (zero row)
    idx2d = idx_flat.reshape(N_pad, 1)

    tab = table
    if V_pad != V:
        tab = jnp.pad(tab, ((0, V_pad - V), (0, 0)))      # padded rows are zero

    grid = (N_pad // T, V_pad // TV)

    in_specs = [
        pl.BlockSpec((T, 1), lambda i, k: (i, 0)),        # token-id tile
        pl.BlockSpec((TV, E), lambda i, k: (k, 0)),       # vocab tile of the table
    ]
    inputs = [idx2d, tab]

    keep_threshold = 0
    if training:
        if p >= 1.0:                                      # PyTorch p=1 -> all zeros
            return jnp.zeros((B, S, E), dtype=table.dtype)
        keep_threshold = min(int(round(p * 2.0 ** 32)), 2 ** 32 - 1)
        if rng is None:
            rng = jax.random.PRNGKey(0)
        bits = jax.random.bits(rng, (N_pad, E), dtype=jnp.uint32)
        in_specs.append(pl.BlockSpec((T, E), lambda i, k: (i, 0)))
        inputs.append(bits)

    kernel = functools.partial(_embedding_kernel, p=p, training=training,
                               keep_threshold=keep_threshold)

    # VMEM budget: double-buffered inputs/output + f32 accumulator (+ headroom).
    tab_itemsize = jnp.dtype(table.dtype).itemsize
    est = (2 * T * 4                      # id tiles
           + 2 * TV * E * tab_itemsize    # table tiles
           + 2 * T * E * 4                # output tiles
           + T * E * 4)                   # accumulator scratch
    if training:
        est += 2 * T * E * 4              # random-bit tiles
    vmem_limit = int(min(max(est + (4 << 20), 16 << 20), 96 << 20))

    grid_spec = pltpu.PrefetchScalarGridSpec(
        num_scalar_prefetch=0,
        grid=grid,
        in_specs=in_specs,
        out_specs=pl.BlockSpec((T, E), lambda i, k: (i, 0)),
        scratch_shapes=[pltpu.VMEM((T, E), jnp.float32)],
    )

    out = pl.pallas_call(
        kernel,
        out_shape=jax.ShapeDtypeStruct((N_pad, E), table.dtype),
        grid_spec=grid_spec,
        compiler_params=pltpu.CompilerParams(
            dimension_semantics=("parallel", "arbitrary"),
            vmem_limit_bytes=vmem_limit),
    )(*inputs)

    return out[:N].reshape(B, S, E)


def make_embedding_table(key, vocab_size, embedding_size):
    # nn.Embedding default init: N(0, 1); padding_idx=0 row is zeroed.
    table = jax.random.normal(key, (vocab_size, embedding_size), dtype=jnp.float32)
    table = table.at[0].set(0.0)
    return table


if __name__ == "__main__":
    key = jax.random.PRNGKey(0)
    k_tab, k_idx, k_drop = jax.random.split(key, 3)

    VOCAB = 32          # input_size
    EMBED = 128         # embedding_size (lane-aligned)
    B, S = 2, 8

    table = make_embedding_table(k_tab, VOCAB, EMBED)
    input_seqs = jax.random.randint(k_idx, (B, S), 0, VOCAB, dtype=jnp.int32)

    # Eval mode (dropout = identity): check exactly against a plain-JAX gather.
    out_eval = jax.block_until_ready(
        embedding_forward(input_seqs, table, p=0.5, training=False))
    ref = table[input_seqs.reshape(-1)].reshape(B, S, EMBED)
    assert out_eval.shape == (B, S, EMBED)
    assert jnp.allclose(out_eval, ref, atol=1e-5), "eval-mode mismatch vs reference"

    # Train mode (inverted dropout, p=0.5, integer-threshold mask).
    out_train = jax.block_until_ready(
        embedding_forward(input_seqs, table, p=0.5, training=True, rng=k_drop))
    assert out_train.shape == (B, S, EMBED)
    assert bool(jnp.all(jnp.isfinite(out_train)))
    # each surviving element must be emb / (1 - p); dropped ones are exactly 0
    scaled_ref = ref * 2.0
    match = jnp.isclose(out_train, scaled_ref, atol=1e-5) | jnp.isclose(out_train, 0.0)
    assert bool(jnp.all(match)), "train-mode dropout invariant violated"
    keep_frac = float(jnp.mean((out_train != 0.0).astype(jnp.float32)))
    assert 0.25 < keep_frac < 0.75, f"unexpected keep fraction {keep_frac}"

    print("KERNEL_OK")
</pallas_src>

<mosaic_0001>
module attributes {stable_mosaic.version = 11 : i64} {
  func.func @_embedding_kernel(%arg0: i32, %arg1: i32, %arg2: memref<16x1xi32, #tpu.memory_space<vmem>>, %arg3: memref<32x128xf32, #tpu.memory_space<vmem>>, %arg4: memref<16x128xf32, #tpu.memory_space<vmem>>, %arg5: memref<16x128xf32, #tpu.memory_space<vmem>>) attributes {dimension_semantics = [#tpu.dimension_semantics<parallel>, #tpu.dimension_semantics<arbitrary>], iteration_bounds = array<i64: 1, 1>, scalar_prefetch = 0 : i64, scratch_operands = 1 : i64, tpu.core_type = #tpu.core_type<tc>, window_params = [{transform_indices = @transform_0, window_bounds = array<i64: 16, 1>}, {transform_indices = @transform_1, window_bounds = array<i64: 32, 128>}, {transform_indices = @transform_2, window_bounds = array<i64: 16, 128>}]} {
    %c0_i32 = arith.constant 0 : i32
    %0 = arith.cmpi eq, %arg1, %c0_i32 : i32
    %1 = arith.extui %0 : i1 to i32
    %c0_i32_0 = arith.constant 0 : i32
    %2 = arith.cmpi ne, %1, %c0_i32_0 : i32
    scf.if %2 {
      %cst_10 = arith.constant 0.000000e+00 : f32
      %20 = vector.broadcast %cst_10 : f32 to vector<16x128xf32>
      %c0_11 = arith.constant 0 : index
      %c0_12 = arith.constant 0 : index
      %21 = vector.load %arg5[%c0_11, %c0_12] : memref<16x128xf32, #tpu.memory_space<vmem>>, vector<16x128xf32>
      tpu.vector_store %arg5[%c0_11, %c0_12], %20 {strides = array<i32>} : memref<16x128xf32, #tpu.memory_space<vmem>>, vector<16x128xf32>,
    } else {
    }
    %c0 = arith.constant 0 : index
    %c0_1 = arith.constant 0 : index
    %3 = vector.load %arg2[%c0, %c0_1] : memref<16x1xi32, #tpu.memory_space<vmem>>, vector<16x1xi32>
    %4 = tpu.iota {dimensions = array<i32: 1>} : vector<16x32xi32>
    %c32_i32 = arith.constant 32 : i32
    %5 = arith.muli %arg1, %c32_i32 : i32
    %6 = vector.broadcast %5 : i32 to vector<16x32xi32>
    %7 = arith.addi %4, %6 : vector<16x32xi32>
    %8 = vector.broadcast %3 : vector<16x1xi32> to vector<16x32xi32>
    %9 = arith.cmpi eq, %7, %8 : vector<16x32xi32>
    %10 = arith.extui %9 : vector<16x32xi1> to vector<16x32xi32>
    %11 = arith.sitofp %10 : vector<16x32xi32> to vector<16x32xf32>
    %c0_2 = arith.constant 0 : index
    %c0_3 = arith.constant 0 : index
    %12 = vector.load %arg5[%c0_2, %c0_3] : memref<16x128xf32, #tpu.memory_space<vmem>>, vector<16x128xf32>
    %c0_4 = arith.constant 0 : index
    %c0_5 = arith.constant 0 : index
    %13 = vector.load %arg3[%c0_4, %c0_5] : memref<32x128xf32, #tpu.memory_space<vmem>>, vector<32x128xf32>
    %cst = arith.constant dense<0.000000e+00> : vector<16x128xf32>
    %14 = tpu.matmul %11, %13, %cst {dimension_numbers = #tpu.dot_dimension_numbers<[1], [0], [0], [1], [0, 0, 1, 1], [], []>} : vector<16x32xf32>, vector<32x128xf32>, vector<16x128xf32> -> vector<16x128xf32>
    %15 = arith.addf %12, %14 : vector<16x128xf32>
    %c0_6 = arith.constant 0 : index
    %c0_7 = arith.constant 0 : index
    %16 = vector.load %arg5[%c0_6, %c0_7] : memref<16x128xf32, #tpu.memory_space<vmem>>, vector<16x128xf32>
    tpu.vector_store %arg5[%c0_6, %c0_7], %15 {strides = array<i32>} : memref<16x128xf32, #tpu.memory_space<vmem>>, vector<16x128xf32>,
    %c0_i32_8 = arith.constant 0 : i32
    %17 = arith.cmpi eq, %arg1, %c0_i32_8 : i32
    %18 = arith.extui %17 : i1 to i32
    %c0_i32_9 = arith.constant 0 : i32
    %19 = arith.cmpi ne, %18, %c0_i32_9 : i32
    scf.if %19 {
      %c0_10 = arith.constant 0 : index
      %c0_11 = arith.constant 0 : index
      %20 = vector.load %arg5[%c0_10, %c0_11] : memref<16x128xf32, #tpu.memory_space<vmem>>, vector<16x128xf32>
      %c0_12 = arith.constant 0 : index
      %c0_13 = arith.constant 0 : index
      %21 = vector.load %arg4[%c0_12, %c0_13] : memref<16x128xf32, #tpu.memory_space<vmem>>, vector<16x128xf32>
      tpu.vector_store %arg4[%c0_12, %c0_13], %20 {strides = array<i32>} : memref<16x128xf32, #tpu.memory_space<vmem>>, vector<16x128xf32>,
    } else {
    }
    return
  }
  func.func @transform_0(%arg0: i32, %arg1: i32) -> (i32, i32) {
    %c0_i32 = arith.constant 0 : i32
    %c0_i32_0 = arith.constant 0 : i32
    return %arg0, %c0_i32 : i32, i32
  }
  func.func @transform_1(%arg0: i32, %arg1: i32) -> (i32, i32) {
    %c0_i32 = arith.constant 0 : i32
    %c0_i32_0 = arith.constant 0 : i32
    return %arg1, %c0_i32 : i32, i32
  }
  func.func @transform_2(%arg0: i32, %arg1: i32) -> (i32, i32) {
    %c0_i32 = arith.constant 0 : i32
    %c0_i32_0 = arith.constant 0 : i32
    return %arg0, %c0_i32 : i32, i32
  }
}

</mosaic_0001>

<bundles_post_ra>
// kernel: tpu_custom_call.1
= control target key start
LH: loop header
LB: loop body
LE: loop exit
PB: predicated region body
PF: predicated region fallthrough
CT: control target
= control target key end

     0   :  { %7 = vsyncpa [#allocation4], 0  ;;  %s308_s0 = inlined_call_operand.vmem [shape: s32[16,1], index: 0, kind: input, shape index: {}]   ;;  %s309_s1 = inlined_call_operand.hbm [shape: f32[32,128], index: 1, kind: input, shape index: {}]   ;;  %s310_s2 = inlined_call_operand.hbm [shape: f32[16,128], index: 2, kind: output, shape index: {}]  }
   0x1   :  { %8 = vsyncpa [#allocation5], 0  ;;  %s251_s9 = smov [#allocation3]   ;;  %s203_s13 = scalar_lea.hbm %s309_s1, 512 }
   0x2   :  { %s16_s10 = sshll.u32 %s251_s9, 4  ;;  %p204_p0 = scmp.ne.s32.totalorder %s309_s1, %s203_s13  ;;  %s17_s10 = int_to_ptr.vmem [resolvable:$true] %s16_s10 }
   0x3   :  { %p207_p1 = scmp.lt.u32.totalorder %s203_s13, %s309_s1 }
   0x5   :  { %p209_p2 = pnand %p207_p1, %p204_p0 }
   0x7   :  { %212 = shalt.err (!%p209_p2)
}
   0x8   :  { %s213_s18 = scalar_lea.vmem %s17_s10, 512  ;;  %p218_p4 = scmp.lt.s32.totalorder %s17_s10, %s17_s10 }
   0x9   :  { %p214_p3 = scmp.ne.s32.totalorder %s17_s10, %s213_s18  ;;  %p219_p5 = scmp.lt.s32.totalorder %s213_s18, %s213_s18 }
   0xb   :  { %p220_p6 = por %p219_p5, %p218_p4 }
   0xd   :  { %p221_p7 = pnand %p220_p6, %p214_p3 }
   0xf   :  { %224 = shalt.err (!%p221_p7)
}
  0x10   :  { %s252_s19 = smov 128   ;;  %s253_s20 = smov 8  }
  0x11   :  { %22 = dma.hbm_to_vmem [thread:$0]  %s309_s1, 512, %s17_s10, [#allocation4], %s252_s19, %s252_s19, %s253_s20  }
  0x12   :  { %247 = dma.done.wait [#allocation4], 512  }
  0x13   :  { %248 = vsyncadd [#allocation4], 4294966784  ;;  %v254_v0 = vmov 0   ;;  %v32_v1 = vld [vmem:[%s308_s0] sm:$0xff]  ;;  %v54_v3 = vld [vmem:[#allocation3 + $0x8] sm:$0xff]  ;;  %v34_v9 = vlaneseq  ;;  %vm57_vm0 = vcmask 261120  }
  0x14   :  { %202 = vset.pattern.permute.xlu0 %v254_v0  ;;  %v53_v2 = vld [vmem:[#allocation3] sm:$0xff]  ;;  %v55_v4 = vld [vmem:[#allocation3 + $0x10] sm:$0xff]  ;;  %v56_v5 = vld [vmem:[#allocation3 + $0x18] sm:$0xff]  ;;  %v255_v12 = vmov 0.0  }
  0x15   :  { %40 = vperm.xlu0 %202, %v32_v1   ;;  %v33_v6 = vld [vmem:[%s308_s0 + $0x8] sm:$0xff]  ;;  %v188_v7 = vpack.c.bf16 %v54_v3, %v53_v2  ;;  %v192_v8 = vpack.c.bf16 %v56_v5, %v55_v4  ;;  %v35_v10 = vand.u32 127, %v34_v9  ;;  %s256_s0 = smov [#allocation6]  }
  0x16   :  { %s155_s1 = sshll.u32 %s256_s0, 4  ;;  %s156_s1 = int_to_ptr.vmem [resolvable:$true] %s155_s1 }
  0x17   :  { %189 = vmatprep.subr.bf16.mxu0 %v188_v7  ;;  %s225_s27 = scalar_lea.vmem %s156_s1, 256  ;;  %p230_p9 = scmp.lt.s32.totalorder %s156_s1, %s156_s1 }
  0x18   :  { %191 = vmatpush3.bf16.msra.mxu0 %v188_v7  ;;  %p226_p8 = scmp.ne.s32.totalorder %s156_s1, %s225_s27  ;;  %p231_p10 = scmp.lt.s32.totalorder %s225_s27, %s225_s27 }
  0x19   :  { %43 = vperm.xlu0 %202, %v33_v6   ;;  %193 = vmatprep.subr.bf16.mxu0 %v192_v8 }
  0x1a   :  { %p232_p11 = por %p231_p10, %p230_p9 }
  0x1c   :  { %195 = vmatpush3.bf16.msra.mxu0 %v192_v8  ;;  %p233_p12 = pnand %p232_p11, %p226_p8 }
  0x94   :  { %v41_v11 = vpop.permute.xlu0 %40 }
  0x95   :  { %vm45_vm1 = vcmp.eq.s32.totalorder %v35_v10, %v41_v11 }
  0x96   :  { %v167_v13 = vsel %vm45_vm1, 1.0, %v255_v12 }
  0x97   :  { %185 = vmatprep.mubr.msk.f32.mxu0 %vm57_vm0, %v167_v13 }
  0x98   :  { %v44_v14 = vpop.permute.xlu0 %43 }
  0x99   :  { %vm46_vm2 = vcmp.eq.s32.totalorder %v35_v10, %v44_v14 }
  0x9a   :  { %v168_v15 = vsel %vm46_vm2, 1.0, %v255_v12 }
  0x9b   :  { %186 = vmatmul.mubr.msk.f32.vlgmr.msra.gmra.mrb[0].mxu0 %vm57_vm0, %v168_v15 }
 0x16e   :  { %v187_v16 = vpop.f32.mrb[0].mxu0 }
 0x16f   :  { %149 = vst [vmem:[#allocation6 + $0x8] sm:$0xff] %v187_v16  ;;  %v130_v17 = vpop.f32.mrb[1].mxu0 }
 0x170   :  { %148 = vst [vmem:[#allocation6] sm:$0xff] %v130_v17 }
 0x171   :  { %236 = shalt.err (!%p233_p12)
}
 0x172   :  { %s237_s30 = scalar_lea.hbm %s310_s2, 256 }
 0x173   :  { %p238_p13 = scmp.ne.s32.totalorder %s310_s2, %s237_s30  ;;  %p241_p0 = scmp.lt.u32.totalorder %s237_s30, %s310_s2 }
 0x175   :  { %p243_p1 = pnand %p241_p0, %p238_p13 }
 0x177   :  { %246 = shalt.err (!%p243_p1)
}
 0x178   :  { %161 = dma.vmem_to_hbm [thread:$0]  %s156_s1, 256, %s310_s2, [#allocation5], %s252_s19, %s252_s19, %s253_s20  }
 0x179   :  { %249 = dma.done.wait [#allocation5], 256  }
 0x17a   :  { %250 = vsyncadd [#allocation5], 4294967040 }
 0x17b   :  { %165 = vsyncpa [#allocation4], 1 }
 0x17c   :  { %166 = vsyncpa [#allocation5], 1 }

</bundles_post_ra>
